<compile_context>
chip_gen: v7x
topology: tpu7x:2x2x1
jax: 0.10.0
libtpu: 0.0.40
codegen_flags: <defaults>
</compile_context>

<pallas_src>
import functools

import jax
import jax.numpy as jnp
from jax.experimental import pallas as pl
from jax.experimental.pallas import tpu as pltpu


def _ray_march_kernel(colors_ref, dens_ref, depths_ref,
                      rgb_ref, depth_ref, weights_ref, bounds_ref,
                      *, white_back, n_valid):
    # colors_ref : VMEM (C, S, TN)
    # dens_ref   : VMEM (S, TN)
    # depths_ref : VMEM (S, TN)
    d = depths_ref[...]                           # (S, TN) float32
    sig = dens_ref[...]                           # (S, TN)
    S, TN = d.shape
    S1 = S - 1

    # ---- per-tile masked depth bounds (fused with the depths read; replaces a
    #      separate full-HBM min/max pass in the wrapper).
    lane = jax.lax.broadcasted_iota(jnp.int32, (1, TN), 1)
    valid = (pl.program_id(0) * TN + lane) < n_valid              # (1, TN)
    d_min = jnp.min(jnp.min(jnp.where(valid, d, jnp.inf),
                            axis=0, keepdims=True), axis=1, keepdims=True)
    d_max = jnp.max(jnp.max(jnp.where(valid, d, -jnp.inf),
                            axis=0, keepdims=True), axis=1, keepdims=True)
    bounds_ref[:, 0:4, :] = jnp.broadcast_to(d_min, (1, 4, 128))
    bounds_ref[:, 4:8, :] = jnp.broadcast_to(d_max, (1, 4, 128))

    # ---- alpha from mid-point densities (clamp_mode == 'softplus')
    deltas = d[1:, :] - d[:-1, :]                                  # (S-1, TN)
    dens_mid = jax.nn.softplus((sig[:-1, :] + sig[1:, :]) * 0.5 - 1.0)
    alpha = 1.0 - jnp.exp(-dens_mid * deltas)                      # (S-1, TN)

    # ---- shifted transmittance  T[i] = prod_{j<i} (1 - alpha[j] + 1e-10)
    # Exclusive cumulative product along the (sublane) sample axis, done as a
    # log2(S-1)-step associative scan over full (S-1, TN) tiles (sublane-dense
    # VPU muls) instead of a row-at-a-time chain.
    om = 1.0 - alpha + 1e-10
    ones_row = jnp.ones((1, TN), jnp.float32)
    if S1 > 1:
        t = jnp.concatenate([ones_row, om[:S1 - 1, :]], axis=0)   # shift by 1
    else:
        t = ones_row
    k = 1
    while k < S1:
        shifted = jnp.concatenate(
            [jnp.ones((k, TN), jnp.float32), t[:S1 - k, :]], axis=0)
        t = t * shifted
        k *= 2
    weights = alpha * t                                            # (S-1, TN)
    weights_ref[...] = weights            # single dense lane-wide store

    # ---- composite depth
    depths_mid = (d[:-1, :] + d[1:, :]) * 0.5
    w_total = jnp.sum(weights, axis=0, keepdims=True)              # (1, TN)
    depth_num = jnp.sum(weights * depths_mid, axis=0, keepdims=True)
    # 0/0 -> NaN here on purpose; nan_to_num + clamp happen on the tiny (1, N)
    # output in the wrapper (matching torch.nan_to_num(inf) + clamp).
    depth_ref[...] = depth_num / w_total

    # ---- composite rgb without materializing colors_mid or the broadcast
    #      product:  comp_rgb = 0.5 * sum_s (w[s-1] + w[s]) * colors[:, s, :]
    if S1 > 1:
        wsum = jnp.concatenate(
            [weights[:1, :], weights[:-1, :] + weights[1:, :], weights[-1:, :]],
            axis=0)                                                # (S, TN)
    else:
        wsum = jnp.concatenate([weights, weights], axis=0)
    acc = wsum[0:1, :] * colors_ref[:, 0, :]                       # (C, TN)
    for s in range(1, S):
        acc = acc + wsum[s:s + 1, :] * colors_ref[:, s, :]
    comp_rgb = 0.5 * acc
    if white_back:
        comp_rgb = comp_rgb + (1.0 - w_total)
    rgb_ref[...] = comp_rgb * 2.0 - 1.0


def _round_up(x, m):
    return (x + m - 1) // m * m


def _chip_defaults():
    """(tile_n, vmem_limit_bytes) per TPU generation."""
    try:
        kind = jax.devices()[0].device_kind.lower()
    except Exception:  # pragma: no cover - e.g. interpret mode / no devices
        kind = ""
    if "v7" in kind:
        # 64 MiB VMEM per TensorCore: cap the tile, keep double-buffering.
        return 16384, 48 * 1024 * 1024
    if ("v6" in kind) or ("v5 lite" in kind) or ("v5e" in kind):
        # 128 MiB VMEM, HBM-bound: big tiles amortize per-grid-step overhead.
        return 32768, 96 * 1024 * 1024
    return 16384, 64 * 1024 * 1024


def mip_ray_marcher2(colors, densities, depths, rendering_options, tile_n=None):
    """JAX/Pallas equivalent of MipRayMarcher2.forward.

    colors:    (B, R, S, C) float
    densities: (B, R, S, 1) float
    depths:    (B, R, S, 1) float
    returns (composite_rgb (B,R,C), composite_depth (B,R,1), weights (B,R,S-1,1))
    """
    assert rendering_options['clamp_mode'] == 'softplus', \
        'MipRayMarcher only supports `clamp_mode`=`softplus`!'
    white_back = bool(rendering_options.get('white_back', False))

    B, R, S, C = colors.shape
    assert S >= 2
    N = B * R
    out_dtype = jnp.result_type(colors.dtype, densities.dtype, depths.dtype)

    chip_tile, vmem_limit = _chip_defaults()
    if tile_n is None:
        tile_n = chip_tile
    tile_n = max(128, min(tile_n, _round_up(N, 128)))
    num_tiles = pl.cdiv(N, tile_n)      # ragged last block, no jnp.pad copies

    # Kernel-native layout: rays on the lane (last) axis.
    # TODO(synk): these three transposes are one extra HBM round trip per
    # input; have the producer emit (C,S,N)/(S,N) directly to remove them.
    colors_t = jnp.transpose(colors.reshape(N, S, C), (2, 1, 0)).astype(jnp.float32)
    dens_t = jnp.transpose(densities.reshape(N, S), (1, 0)).astype(jnp.float32)
    depths_t = jnp.transpose(depths.reshape(N, S), (1, 0)).astype(jnp.float32)

    kernel = functools.partial(_ray_march_kernel, white_back=white_back,
                               n_valid=N)

    rgb_t, depth_t, weights_t, tile_bounds = pl.pallas_call(
        kernel,
        grid=(num_tiles,),
        in_specs=[
            pl.BlockSpec((C, S, tile_n), lambda i: (0, 0, i)),     # colors
            pl.BlockSpec((S, tile_n), lambda i: (0, i)),           # densities
            pl.BlockSpec((S, tile_n), lambda i: (0, i)),           # depths
        ],
        out_specs=[
            pl.BlockSpec((C, tile_n), lambda i: (0, i)),           # rgb
            pl.BlockSpec((1, tile_n), lambda i: (0, i)),           # depth
            pl.BlockSpec((S - 1, tile_n), lambda i: (0, i)),       # weights
            pl.BlockSpec((1, 8, 128), lambda i: (i, 0, 0)),        # depth bounds
        ],
        out_shape=[
            jax.ShapeDtypeStruct((C, N), jnp.float32),
            jax.ShapeDtypeStruct((1, N), jnp.float32),
            jax.ShapeDtypeStruct((S - 1, N), jnp.float32),
            jax.ShapeDtypeStruct((num_tiles, 8, 128), jnp.float32),
        ],
        compiler_params=pltpu.CompilerParams(
            dimension_semantics=("parallel",),
            vmem_limit_bytes=vmem_limit,
        ),
    )(colors_t, dens_t, depths_t)

    # Global depth bounds from the per-tile (masked) reductions; nan_to_num +
    # clamp on the tiny (1, N) output (equivalent to torch.nan_to_num(inf) +
    # clamp(min(depths), max(depths)) since the clamp follows immediately).
    gmin = jnp.min(tile_bounds[:, 0, 0])
    gmax = jnp.max(tile_bounds[:, 4, 0])
    depth_t = jnp.where(jnp.isnan(depth_t), jnp.inf, depth_t)
    depth_t = jnp.clip(depth_t, gmin, gmax)

    # Back to the PyTorch convention (small outputs -> cheap transposes).
    composite_rgb = jnp.transpose(rgb_t, (1, 0)).reshape(B, R, C).astype(out_dtype)
    composite_depth = depth_t.reshape(B, R, 1).astype(out_dtype)
    weights = jnp.transpose(weights_t, (1, 0)).reshape(B, R, S - 1, 1).astype(out_dtype)
    return composite_rgb, composite_depth, weights


def _reference(colors, densities, depths, rendering_options):
    """Pure-JAX reference mirroring the PyTorch code (for verification)."""
    deltas = depths[:, :, 1:] - depths[:, :, :-1]
    colors_mid = (colors[:, :, :-1] + colors[:, :, 1:]) / 2
    densities_mid = (densities[:, :, :-1] + densities[:, :, 1:]) / 2
    depths_mid = (depths[:, :, :-1] + depths[:, :, 1:]) / 2
    densities_mid = jax.nn.softplus(densities_mid - 1)
    density_delta = densities_mid * deltas
    alpha = 1 - jnp.exp(-density_delta)
    alpha_shifted = jnp.concatenate(
        [jnp.ones_like(alpha[:, :, :1]), 1 - alpha + 1e-10], axis=-2)
    weights = alpha * jnp.cumprod(alpha_shifted, axis=-2)[:, :, :-1]
    composite_rgb = jnp.sum(weights * colors_mid, axis=-2)
    weight_total = weights.sum(2)
    composite_depth = jnp.sum(weights * depths_mid, axis=-2) / weight_total
    composite_depth = jnp.where(jnp.isnan(composite_depth), jnp.inf, composite_depth)
    composite_depth = jnp.clip(composite_depth, jnp.min(depths), jnp.max(depths))
    if rendering_options.get('white_back', False):
        composite_rgb = composite_rgb + 1 - weight_total
    composite_rgb = composite_rgb * 2 - 1
    return composite_rgb, composite_depth, weights


if __name__ == "__main__":
    key = jax.random.PRNGKey(0)
    S, C = 12, 3          # depth samples, rgb channels
    ok = True

    # Case 1: N a multiple of 128 (single full tile).
    # Case 2: N = 200 with tile_n = 128 -> two tiles, ragged last block.
    for (B, R, tn) in [(2, 64, None), (2, 100, 128)]:
        key, kc, kd, kz = jax.random.split(key, 4)
        colors = jax.random.uniform(kc, (B, R, S, C), dtype=jnp.float32)
        densities = jax.random.normal(kd, (B, R, S, 1), dtype=jnp.float32)
        # monotonically increasing depths along the sample axis
        depths = jnp.sort(
            jax.random.uniform(kz, (B, R, S, 1), dtype=jnp.float32,
                               minval=0.5, maxval=2.5), axis=2)

        for white_back in (False, True):
            rendering_options = {'clamp_mode': 'softplus',
                                 'white_back': white_back}

            rgb, depth, weights = mip_ray_marcher2(
                colors, densities, depths, rendering_options, tile_n=tn)
            jax.block_until_ready((rgb, depth, weights))

            rgb_ref, depth_ref, weights_ref = _reference(
                colors, densities, depths, rendering_options)

            ok &= rgb.shape == (B, R, C)
            ok &= depth.shape == (B, R, 1)
            ok &= weights.shape == (B, R, S - 1, 1)
            ok &= bool(jnp.allclose(rgb, rgb_ref, atol=1e-5))
            ok &= bool(jnp.allclose(depth, depth_ref, atol=1e-5))
            ok &= bool(jnp.allclose(weights, weights_ref, atol=1e-5))

    assert ok
    print("KERNEL_OK")
</pallas_src>

<mosaic_0001>
module attributes {stable_mosaic.version = 11 : i64} {
  func.func @_ray_march_kernel(%arg0: i32, %arg1: memref<3x12x128xf32, #tpu.memory_space<vmem>>, %arg2: memref<12x128xf32, #tpu.memory_space<vmem>>, %arg3: memref<12x128xf32, #tpu.memory_space<vmem>>, %arg4: memref<3x128xf32, #tpu.memory_space<vmem>>, %arg5: memref<1x128xf32, #tpu.memory_space<vmem>>, %arg6: memref<11x128xf32, #tpu.memory_space<vmem>>, %arg7: memref<1x8x128xf32, #tpu.memory_space<vmem>>) attributes {dimension_semantics = [#tpu.dimension_semantics<parallel>], iteration_bounds = array<i64: 1>, scalar_prefetch = 0 : i64, scratch_operands = 0 : i64, tpu.core_type = #tpu.core_type<tc>, window_params = [{transform_indices = @transform_0, window_bounds = array<i64: 3, 12, 128>}, {transform_indices = @transform_1, window_bounds = array<i64: 12, 128>}, {transform_indices = @transform_2, window_bounds = array<i64: 12, 128>}, {transform_indices = @transform_3, window_bounds = array<i64: 3, 128>}, {transform_indices = @transform_4, window_bounds = array<i64: 1, 128>}, {transform_indices = @transform_5, window_bounds = array<i64: 11, 128>}, {transform_indices = @transform_6, window_bounds = array<i64: 1, 8, 128>}]} {
    %c0 = arith.constant 0 : index
    %c0_0 = arith.constant 0 : index
    %0 = vector.load %arg3[%c0, %c0_0] : memref<12x128xf32, #tpu.memory_space<vmem>>, vector<12x128xf32>
    %c0_1 = arith.constant 0 : index
    %c0_2 = arith.constant 0 : index
    %1 = vector.load %arg2[%c0_1, %c0_2] : memref<12x128xf32, #tpu.memory_space<vmem>>, vector<12x128xf32>
    %2 = tpu.iota {dimensions = array<i32: 1>} : vector<1x128xi32>
    %c128_i32 = arith.constant 128 : i32
    %3 = arith.muli %arg0, %c128_i32 : i32
    %4 = vector.broadcast %3 : i32 to vector<1x128xi32>
    %5 = arith.addi %4, %2 : vector<1x128xi32>
    %c128_i32_3 = arith.constant 128 : i32
    %6 = vector.broadcast %c128_i32_3 : i32 to vector<1x128xi32>
    %7 = arith.cmpi slt, %5, %6 : vector<1x128xi32>
    %cst = arith.constant 0x7F800000 : f32
    %8 = vector.shape_cast %7 : vector<1x128xi1> to vector<1x128xi1>
    %9 = vector.broadcast %8 : vector<1x128xi1> to vector<12x128xi1>
    %10 = vector.broadcast %cst : f32 to vector<12x128xf32>
    %11 = arith.select %9, %0, %10 : vector<12x128xi1>, vector<12x128xf32>
    %cst_4 = arith.constant dense<0x7F800000> : vector<128xf32>
    %12 = vector.multi_reduction <minimumf>, %11, %cst_4 [0] : vector<12x128xf32> to vector<128xf32>
    %13 = vector.shape_cast %12 : vector<128xf32> to vector<1x128xf32>
    %cst_5 = arith.constant dense<0x7F800000> : vector<1xf32>
    %14 = vector.multi_reduction <minimumf>, %13, %cst_5 [1] : vector<1x128xf32> to vector<1xf32>
    %15 = vector.shape_cast %14 : vector<1xf32> to vector<1x1xf32>
    %cst_6 = arith.constant 0xFF800000 : f32
    %16 = vector.shape_cast %7 : vector<1x128xi1> to vector<1x128xi1>
    %17 = vector.broadcast %16 : vector<1x128xi1> to vector<12x128xi1>
    %18 = vector.broadcast %cst_6 : f32 to vector<12x128xf32>
    %19 = arith.select %17, %0, %18 : vector<12x128xi1>, vector<12x128xf32>
    %cst_7 = arith.constant dense<0xFF800000> : vector<128xf32>
    %20 = vector.multi_reduction <maximumf>, %19, %cst_7 [0] : vector<12x128xf32> to vector<128xf32>
    %21 = vector.shape_cast %20 : vector<128xf32> to vector<1x128xf32>
    %cst_8 = arith.constant dense<0xFF800000> : vector<1xf32>
    %22 = vector.multi_reduction <maximumf>, %21, %cst_8 [1] : vector<1x128xf32> to vector<1xf32>
    %23 = vector.shape_cast %22 : vector<1xf32> to vector<1x1xf32>
    %24 = vector.shape_cast %15 : vector<1x1xf32> to vector<1x1x1xf32>
    %25 = vector.broadcast %24 : vector<1x1x1xf32> to vector<1x4x128xf32>
    %c0_9 = arith.constant 0 : index
    %c0_10 = arith.constant 0 : index
    %c0_11 = arith.constant 0 : index
    %26 = vector.load %arg7[%c0_9, %c0_10, %c0_11] : memref<1x8x128xf32, #tpu.memory_space<vmem>>, vector<1x4x128xf32>
    tpu.vector_store %arg7[%c0_9, %c0_10, %c0_11], %25 {strides = array<i32>} : memref<1x8x128xf32, #tpu.memory_space<vmem>>, vector<1x4x128xf32>,
    %27 = vector.shape_cast %23 : vector<1x1xf32> to vector<1x1x1xf32>
    %28 = vector.broadcast %27 : vector<1x1x1xf32> to vector<1x4x128xf32>
    %c0_12 = arith.constant 0 : index
    %c4 = arith.constant 4 : index
    %c0_13 = arith.constant 0 : index
    %29 = vector.load %arg7[%c0_12, %c4, %c0_13] : memref<1x8x128xf32, #tpu.memory_space<vmem>>, vector<1x4x128xf32>
    tpu.vector_store %arg7[%c0_12, %c4, %c0_13], %28 {strides = array<i32>} : memref<1x8x128xf32, #tpu.memory_space<vmem>>, vector<1x4x128xf32>,
    %30 = vector.extract_strided_slice %0 {offsets = [1, 0], sizes = [11, 128], strides = [1, 1]} : vector<12x128xf32> to vector<11x128xf32>
    %31 = vector.extract_strided_slice %0 {offsets = [0, 0], sizes = [11, 128], strides = [1, 1]} : vector<12x128xf32> to vector<11x128xf32>
    %32 = arith.subf %30, %31 : vector<11x128xf32>
    %33 = vector.extract_strided_slice %1 {offsets = [0, 0], sizes = [11, 128], strides = [1, 1]} : vector<12x128xf32> to vector<11x128xf32>
    %34 = vector.extract_strided_slice %1 {offsets = [1, 0], sizes = [11, 128], strides = [1, 1]} : vector<12x128xf32> to vector<11x128xf32>
    %35 = arith.addf %33, %34 : vector<11x128xf32>
    %cst_14 = arith.constant 5.000000e-01 : f32
    %36 = vector.broadcast %cst_14 : f32 to vector<11x128xf32>
    %37 = arith.mulf %35, %36 : vector<11x128xf32>
    %cst_15 = arith.constant 1.000000e+00 : f32
    %38 = vector.broadcast %cst_15 : f32 to vector<11x128xf32>
    %39 = arith.subf %37, %38 : vector<11x128xf32>
    %cst_16 = arith.constant 0.000000e+00 : f32
    %40 = vector.broadcast %cst_16 : f32 to vector<11x128xf32>
    %41 = arith.maximumf %39, %40 : vector<11x128xf32>
    %42 = vector.broadcast %cst_16 : f32 to vector<11x128xf32>
    %43 = arith.subf %39, %42 : vector<11x128xf32>
    %44 = arith.cmpf one, %43, %43 : vector<11x128xf32>
    %45 = vector.broadcast %cst_16 : f32 to vector<11x128xf32>
    %46 = arith.addf %39, %45 : vector<11x128xf32>
    %47 = math.absf %43 : vector<11x128xf32>
    %cst_17 = arith.constant 0.000000e+00 : f32
    %48 = vector.broadcast %cst_17 : f32 to vector<11x128xf32>
    %49 = arith.subf %48, %47 : vector<11x128xf32>
    %50 = math.exp %49 : vector<11x128xf32>
    %51 = math.log1p %50 : vector<11x128xf32>
    %52 = arith.addf %41, %51 : vector<11x128xf32>
    %53 = arith.select %44, %46, %52 : vector<11x128xi1>, vector<11x128xf32>
    %cst_18 = arith.constant 0.000000e+00 : f32
    %54 = vector.broadcast %cst_18 : f32 to vector<11x128xf32>
    %55 = arith.subf %54, %53 : vector<11x128xf32>
    %56 = arith.mulf %55, %32 : vector<11x128xf32>
    %57 = math.exp %56 : vector<11x128xf32>
    %cst_19 = arith.constant 1.000000e+00 : f32
    %58 = vector.broadcast %cst_19 : f32 to vector<11x128xf32>
    %59 = arith.subf %58, %57 : vector<11x128xf32>
    %cst_20 = arith.constant 1.000000e+00 : f32
    %60 = vector.broadcast %cst_20 : f32 to vector<11x128xf32>
    %61 = arith.subf %60, %59 : vector<11x128xf32>
    %cst_21 = arith.constant 1.000000e-10 : f32
    %62 = vector.broadcast %cst_21 : f32 to vector<11x128xf32>
    %63 = arith.addf %61, %62 : vector<11x128xf32>
    %cst_22 = arith.constant 1.000000e+00 : f32
    %64 = vector.broadcast %cst_22 : f32 to vector<1x128xf32>
    %65 = vector.extract_strided_slice %63 {offsets = [0, 0], sizes = [10, 128], strides = [1, 1]} : vector<11x128xf32> to vector<10x128xf32>
    %66 = tpu.concatenate %64, %65 in 0 : vector<1x128xf32>, vector<10x128xf32> -> vector<11x128xf32>
    %cst_23 = arith.constant 1.000000e+00 : f32
    %67 = vector.broadcast %cst_23 : f32 to vector<1x128xf32>
    %68 = vector.extract_strided_slice %66 {offsets = [0, 0], sizes = [10, 128], strides = [1, 1]} : vector<11x128xf32> to vector<10x128xf32>
    %69 = tpu.concatenate %67, %68 in 0 : vector<1x128xf32>, vector<10x128xf32> -> vector<11x128xf32>
    %70 = arith.mulf %66, %69 : vector<11x128xf32>
    %cst_24 = arith.constant 1.000000e+00 : f32
    %71 = vector.broadcast %cst_24 : f32 to vector<2x128xf32>
    %72 = vector.extract_strided_slice %70 {offsets = [0, 0], sizes = [9, 128], strides = [1, 1]} : vector<11x128xf32> to vector<9x128xf32>
    %73 = tpu.concatenate %71, %72 in 0 : vector<2x128xf32>, vector<9x128xf32> -> vector<11x128xf32>
    %74 = arith.mulf %70, %73 : vector<11x128xf32>
    %cst_25 = arith.constant 1.000000e+00 : f32
    %75 = vector.broadcast %cst_25 : f32 to vector<4x128xf32>
    %76 = vector.extract_strided_slice %74 {offsets = [0, 0], sizes = [7, 128], strides = [1, 1]} : vector<11x128xf32> to vector<7x128xf32>
    %77 = tpu.concatenate %75, %76 in 0 : vector<4x128xf32>, vector<7x128xf32> -> vector<11x128xf32>
    %78 = arith.mulf %74, %77 : vector<11x128xf32>
    %cst_26 = arith.constant 1.000000e+00 : f32
    %79 = vector.broadcast %cst_26 : f32 to vector<8x128xf32>
    %80 = vector.extract_strided_slice %78 {offsets = [0, 0], sizes = [3, 128], strides = [1, 1]} : vector<11x128xf32> to vector<3x128xf32>
    %81 = tpu.concatenate %79, %80 in 0 : vector<8x128xf32>, vector<3x128xf32> -> vector<11x128xf32>
    %82 = arith.mulf %78, %81 : vector<11x128xf32>
    %83 = arith.mulf %59, %82 : vector<11x128xf32>
    %c0_27 = arith.constant 0 : index
    %c0_28 = arith.constant 0 : index
    %84 = vector.load %arg6[%c0_27, %c0_28] : memref<11x128xf32, #tpu.memory_space<vmem>>, vector<11x128xf32>
    tpu.vector_store %arg6[%c0_27, %c0_28], %83 {strides = array<i32>} : memref<11x128xf32, #tpu.memory_space<vmem>>, vector<11x128xf32>,
    %85 = vector.extract_strided_slice %0 {offsets = [0, 0], sizes = [11, 128], strides = [1, 1]} : vector<12x128xf32> to vector<11x128xf32>
    %86 = vector.extract_strided_slice %0 {offsets = [1, 0], sizes = [11, 128], strides = [1, 1]} : vector<12x128xf32> to vector<11x128xf32>
    %87 = arith.addf %85, %86 : vector<11x128xf32>
    %cst_29 = arith.constant 5.000000e-01 : f32
    %88 = vector.broadcast %cst_29 : f32 to vector<11x128xf32>
    %89 = arith.mulf %87, %88 : vector<11x128xf32>
    %cst_30 = arith.constant dense<0.000000e+00> : vector<128xf32>
    %90 = vector.multi_reduction <add>, %83, %cst_30 [0] : vector<11x128xf32> to vector<128xf32>
    %91 = vector.shape_cast %90 : vector<128xf32> to vector<1x128xf32>
    %92 = arith.mulf %83, %89 : vector<11x128xf32>
    %cst_31 = arith.constant dense<0.000000e+00> : vector<128xf32>
    %93 = vector.multi_reduction <add>, %92, %cst_31 [0] : vector<11x128xf32> to vector<128xf32>
    %94 = vector.shape_cast %93 : vector<128xf32> to vector<1x128xf32>
    %95 = arith.divf %94, %91 : vector<1x128xf32>
    %c0_32 = arith.constant 0 : index
    %c0_33 = arith.constant 0 : index
    %96 = vector.load %arg5[%c0_32, %c0_33] : memref<1x128xf32, #tpu.memory_space<vmem>>, vector<1x128xf32>
    tpu.vector_store %arg5[%c0_32, %c0_33], %95 {strides = array<i32>} : memref<1x128xf32, #tpu.memory_space<vmem>>, vector<1x128xf32>,
    %97 = vector.extract_strided_slice %83 {offsets = [0, 0], sizes = [1, 128], strides = [1, 1]} : vector<11x128xf32> to vector<1x128xf32>
    %98 = vector.extract_strided_slice %83 {offsets = [0, 0], sizes = [10, 128], strides = [1, 1]} : vector<11x128xf32> to vector<10x128xf32>
    %99 = vector.extract_strided_slice %83 {offsets = [1, 0], sizes = [10, 128], strides = [1, 1]} : vector<11x128xf32> to vector<10x128xf32>
    %100 = arith.addf %98, %99 : vector<10x128xf32>
    %101 = vector.extract_strided_slice %83 {offsets = [10, 0], sizes = [1, 128], strides = [1, 1]} : vector<11x128xf32> to vector<1x128xf32>
    %102 = tpu.concatenate %97, %100, %101 in 0 : vector<1x128xf32>, vector<10x128xf32>, vector<1x128xf32> -> vector<12x128xf32>
    %103 = vector.extract_strided_slice %102 {offsets = [0, 0], sizes = [1, 128], strides = [1, 1]} : vector<12x128xf32> to vector<1x128xf32>
    %c0_34 = arith.constant 0 : index
    %c0_35 = arith.constant 0 : index
    %c0_36 = arith.constant 0 : index
    %104 = vector.load %arg1[%c0_34, %c0_35, %c0_36] : memref<3x12x128xf32, #tpu.memory_space<vmem>>, vector<3x1x128xf32>
    %105 = vector.shape_cast %104 : vector<3x1x128xf32> to vector<3x128xf32>
    %106 = vector.broadcast %103 : vector<1x128xf32> to vector<3x128xf32>
    %107 = arith.mulf %106, %105 : vector<3x128xf32>
    %108 = vector.extract_strided_slice %102 {offsets = [1, 0], sizes = [1, 128], strides = [1, 1]} : vector<12x128xf32> to vector<1x128xf32>
    %c0_37 = arith.constant 0 : index
    %c1 = arith.constant 1 : index
    %c0_38 = arith.constant 0 : index
    %109 = vector.load %arg1[%c0_37, %c1, %c0_38] : memref<3x12x128xf32, #tpu.memory_space<vmem>>, vector<3x1x128xf32>
    %110 = vector.shape_cast %109 : vector<3x1x128xf32> to vector<3x128xf32>
    %111 = vector.broadcast %108 : vector<1x128xf32> to vector<3x128xf32>
    %112 = arith.mulf %111, %110 : vector<3x128xf32>
    %113 = arith.addf %107, %112 : vector<3x128xf32>
    %114 = vector.extract_strided_slice %102 {offsets = [2, 0], sizes = [1, 128], strides = [1, 1]} : vector<12x128xf32> to vector<1x128xf32>
    %c0_39 = arith.constant 0 : index
    %c2 = arith.constant 2 : index
    %c0_40 = arith.constant 0 : index
    %115 = vector.load %arg1[%c0_39, %c2, %c0_40] : memref<3x12x128xf32, #tpu.memory_space<vmem>>, vector<3x1x128xf32>
    %116 = vector.shape_cast %115 : vector<3x1x128xf32> to vector<3x128xf32>
    %117 = vector.broadcast %114 : vector<1x128xf32> to vector<3x128xf32>
    %118 = arith.mulf %117, %116 : vector<3x128xf32>
    %119 = arith.addf %113, %118 : vector<3x128xf32>
    %120 = vector.extract_strided_slice %102 {offsets = [3, 0], sizes = [1, 128], strides = [1, 1]} : vector<12x128xf32> to vector<1x128xf32>
    %c0_41 = arith.constant 0 : index
    %c3 = arith.constant 3 : index
    %c0_42 = arith.constant 0 : index
    %121 = vector.load %arg1[%c0_41, %c3, %c0_42] : memref<3x12x128xf32, #tpu.memory_space<vmem>>, vector<3x1x128xf32>
    %122 = vector.shape_cast %121 : vector<3x1x128xf32> to vector<3x128xf32>
    %123 = vector.broadcast %120 : vector<1x128xf32> to vector<3x128xf32>
    %124 = arith.mulf %123, %122 : vector<3x128xf32>
    %125 = arith.addf %119, %124 : vector<3x128xf32>
    %126 = vector.extract_strided_slice %102 {offsets = [4, 0], sizes = [1, 128], strides = [1, 1]} : vector<12x128xf32> to vector<1x128xf32>
    %c0_43 = arith.constant 0 : index
    %c4_44 = arith.constant 4 : index
    %c0_45 = arith.constant 0 : index
    %127 = vector.load %arg1[%c0_43, %c4_44, %c0_45] : memref<3x12x128xf32, #tpu.memory_space<vmem>>, vector<3x1x128xf32>
    %128 = vector.shape_cast %127 : vector<3x1x128xf32> to vector<3x128xf32>
    %129 = vector.broadcast %126 : vector<1x128xf32> to vector<3x128xf32>
    %130 = arith.mulf %129, %128 : vector<3x128xf32>
    %131 = arith.addf %125, %130 : vector<3x128xf32>
    %132 = vector.extract_strided_slice %102 {offsets = [5, 0], sizes = [1, 128], strides = [1, 1]} : vector<12x128xf32> to vector<1x128xf32>
    %c0_46 = arith.constant 0 : index
    %c5 = arith.constant 5 : index
    %c0_47 = arith.constant 0 : index
    %133 = vector.load %arg1[%c0_46, %c5, %c0_47] : memref<3x12x128xf32, #tpu.memory_space<vmem>>, vector<3x1x128xf32>
    %134 = vector.shape_cast %133 : vector<3x1x128xf32> to vector<3x128xf32>
    %135 = vector.broadcast %132 : vector<1x128xf32> to vector<3x128xf32>
    %136 = arith.mulf %135, %134 : vector<3x128xf32>
    %137 = arith.addf %131, %136 : vector<3x128xf32>
    %138 = vector.extract_strided_slice %102 {offsets = [6, 0], sizes = [1, 128], strides = [1, 1]} : vector<12x128xf32> to vector<1x128xf32>
    %c0_48 = arith.constant 0 : index
    %c6 = arith.constant 6 : index
    %c0_49 = arith.constant 0 : index
    %139 = vector.load %arg1[%c0_48, %c6, %c0_49] : memref<3x12x128xf32, #tpu.memory_space<vmem>>, vector<3x1x128xf32>
    %140 = vector.shape_cast %139 : vector<3x1x128xf32> to vector<3x128xf32>
    %141 = vector.broadcast %138 : vector<1x128xf32> to vector<3x128xf32>
    %142 = arith.mulf %141, %140 : vector<3x128xf32>
    %143 = arith.addf %137, %142 : vector<3x128xf32>
    %144 = vector.extract_strided_slice %102 {offsets = [7, 0], sizes = [1, 128], strides = [1, 1]} : vector<12x128xf32> to vector<1x128xf32>
    %c0_50 = arith.constant 0 : index
    %c7 = arith.constant 7 : index
    %c0_51 = arith.constant 0 : index
    %145 = vector.load %arg1[%c0_50, %c7, %c0_51] : memref<3x12x128xf32, #tpu.memory_space<vmem>>, vector<3x1x128xf32>
    %146 = vector.shape_cast %145 : vector<3x1x128xf32> to vector<3x128xf32>
    %147 = vector.broadcast %144 : vector<1x128xf32> to vector<3x128xf32>
    %148 = arith.mulf %147, %146 : vector<3x128xf32>
    %149 = arith.addf %143, %148 : vector<3x128xf32>
    %150 = vector.extract_strided_slice %102 {offsets = [8, 0], sizes = [1, 128], strides = [1, 1]} : vector<12x128xf32> to vector<1x128xf32>
    %c0_52 = arith.constant 0 : index
    %c8 = arith.constant 8 : index
    %c0_53 = arith.constant 0 : index
    %151 = vector.load %arg1[%c0_52, %c8, %c0_53] : memref<3x12x128xf32, #tpu.memory_space<vmem>>, vector<3x1x128xf32>
    %152 = vector.shape_cast %151 : vector<3x1x128xf32> to vector<3x128xf32>
    %153 = vector.broadcast %150 : vector<1x128xf32> to vector<3x128xf32>
    %154 = arith.mulf %153, %152 : vector<3x128xf32>
    %155 = arith.addf %149, %154 : vector<3x128xf32>
    %156 = vector.extract_strided_slice %102 {offsets = [9, 0], sizes = [1, 128], strides = [1, 1]} : vector<12x128xf32> to vector<1x128xf32>
    %c0_54 = arith.constant 0 : index
    %c9 = arith.constant 9 : index
    %c0_55 = arith.constant 0 : index
    %157 = vector.load %arg1[%c0_54, %c9, %c0_55] : memref<3x12x128xf32, #tpu.memory_space<vmem>>, vector<3x1x128xf32>
    %158 = vector.shape_cast %157 : vector<3x1x128xf32> to vector<3x128xf32>
    %159 = vector.broadcast %156 : vector<1x128xf32> to vector<3x128xf32>
    %160 = arith.mulf %159, %158 : vector<3x128xf32>
    %161 = arith.addf %155, %160 : vector<3x128xf32>
    %162 = vector.extract_strided_slice %102 {offsets = [10, 0], sizes = [1, 128], strides = [1, 1]} : vector<12x128xf32> to vector<1x128xf32>
    %c0_56 = arith.constant 0 : index
    %c10 = arith.constant 10 : index
    %c0_57 = arith.constant 0 : index
    %163 = vector.load %arg1[%c0_56, %c10, %c0_57] : memref<3x12x128xf32, #tpu.memory_space<vmem>>, vector<3x1x128xf32>
    %164 = vector.shape_cast %163 : vector<3x1x128xf32> to vector<3x128xf32>
    %165 = vector.broadcast %162 : vector<1x128xf32> to vector<3x128xf32>
    %166 = arith.mulf %165, %164 : vector<3x128xf32>
    %167 = arith.addf %161, %166 : vector<3x128xf32>
    %168 = vector.extract_strided_slice %102 {offsets = [11, 0], sizes = [1, 128], strides = [1, 1]} : vector<12x128xf32> to vector<1x128xf32>
    %c0_58 = arith.constant 0 : index
    %c11 = arith.constant 11 : index
    %c0_59 = arith.constant 0 : index
    %169 = vector.load %arg1[%c0_58, %c11, %c0_59] : memref<3x12x128xf32, #tpu.memory_space<vmem>>, vector<3x1x128xf32>
    %170 = vector.shape_cast %169 : vector<3x1x128xf32> to vector<3x128xf32>
    %171 = vector.broadcast %168 : vector<1x128xf32> to vector<3x128xf32>
    %172 = arith.mulf %171, %170 : vector<3x128xf32>
    %173 = arith.addf %167, %172 : vector<3x128xf32>
    %cst_60 = arith.constant 5.000000e-01 : f32
    %174 = vector.broadcast %cst_60 : f32 to vector<3x128xf32>
    %175 = arith.mulf %174, %173 : vector<3x128xf32>
    %cst_61 = arith.constant 2.000000e+00 : f32
    %176 = vector.broadcast %cst_61 : f32 to vector<3x128xf32>
    %177 = arith.mulf %175, %176 : vector<3x128xf32>
    %cst_62 = arith.constant 1.000000e+00 : f32
    %178 = vector.broadcast %cst_62 : f32 to vector<3x128xf32>
    %179 = arith.subf %177, %178 : vector<3x128xf32>
    %c0_63 = arith.constant 0 : index
    %c0_64 = arith.constant 0 : index
    %180 = vector.load %arg4[%c0_63, %c0_64] : memref<3x128xf32, #tpu.memory_space<vmem>>, vector<3x128xf32>
    tpu.vector_store %arg4[%c0_63, %c0_64], %179 {strides = array<i32>} : memref<3x128xf32, #tpu.memory_space<vmem>>, vector<3x128xf32>,
    return
  }
  func.func @transform_0(%arg0: i32) -> (i32, i32, i32) {
    %c0_i32 = arith.constant 0 : i32
    %c0_i32_0 = arith.constant 0 : i32
    %c0_i32_1 = arith.constant 0 : i32
    return %c0_i32, %c0_i32_0, %arg0 : i32, i32, i32
  }
  func.func @transform_1(%arg0: i32) -> (i32, i32) {
    %c0_i32 = arith.constant 0 : i32
    %c0_i32_0 = arith.constant 0 : i32
    return %c0_i32, %arg0 : i32, i32
  }
  func.func @transform_2(%arg0: i32) -> (i32, i32) {
    %c0_i32 = arith.constant 0 : i32
    %c0_i32_0 = arith.constant 0 : i32
    return %c0_i32, %arg0 : i32, i32
  }
  func.func @transform_3(%arg0: i32) -> (i32, i32) {
    %c0_i32 = arith.constant 0 : i32
    %c0_i32_0 = arith.constant 0 : i32
    return %c0_i32, %arg0 : i32, i32
  }
  func.func @transform_4(%arg0: i32) -> (i32, i32) {
    %c0_i32 = arith.constant 0 : i32
    %c0_i32_0 = arith.constant 0 : i32
    return %c0_i32, %arg0 : i32, i32
  }
  func.func @transform_5(%arg0: i32) -> (i32, i32) {
    %c0_i32 = arith.constant 0 : i32
    %c0_i32_0 = arith.constant 0 : i32
    return %c0_i32, %arg0 : i32, i32
  }
  func.func @transform_6(%arg0: i32) -> (i32, i32, i32) {
    %c0_i32 = arith.constant 0 : i32
    %c0_i32_0 = arith.constant 0 : i32
    %c0_i32_1 = arith.constant 0 : i32
    return %arg0, %c0_i32, %c0_i32_0 : i32, i32, i32
  }
}

</mosaic_0001>

<bundles_post_ra>
// kernel: tpu_custom_call.1
= control target key start
LH: loop header
LB: loop body
LE: loop exit
PB: predicated region body
PF: predicated region fallthrough
CT: control target
= control target key end

     0   :  { %12 = vsyncpa [#allocation3], 0  ;;  %s987_s0 = inlined_call_operand.hbm [shape: f32[3,12,128], index: 0, kind: input, shape index: {}]   ;;  %s988_s1 = inlined_call_operand.hbm [shape: f32[12,128], index: 1, kind: input, shape index: {}]   ;;  %s989_s2 = inlined_call_operand.hbm [shape: f32[12,128], index: 2, kind: input, shape index: {}]   ;;  %s990_s3 = inlined_call_operand.hbm [shape: f32[3,128], index: 3, kind: output, shape index: {0}]   ;;  %s991_s4 = inlined_call_operand.hbm [shape: f32[1,128], index: 4, kind: output, shape index: {1}]   ;;  %s992_s5 = inlined_call_operand.hbm [shape: f32[11,128], index: 5, kind: output, shape index: {2}]   ;;  %s993_s6 = inlined_call_operand.hbm [shape: f32[1,8,128], index: 6, kind: output, shape index: {3}]  }
   0x1   :  { %13 = vsyncpa [#allocation6], 0 }
   0x2   :  { %14 = vsyncpa [#allocation4], 0 }
   0x3   :  { %15 = vsyncpa [#allocation10], 0 }
   0x4   :  { %16 = vsyncpa [#allocation13], 0  ;;  %s730_s21 = smov [#allocation5]   ;;  %s731_s23 = smov [#allocation2]  }
   0x5   :  { %s34_s22 = sshll.u32 %s730_s21, 4  ;;  %s22_s24 = sshll.u32 %s731_s23, 4  ;;  %s35_s22 = int_to_ptr.vmem [resolvable:$true] %s34_s22  ;;  %s774_s24 = int_to_ptr.vmem [resolvable:$true] %s22_s24 }
   0x6   :  { %s566_s27 = scalar_lea.hbm %s988_s1, 256 }
   0x7   :  { %p567_p0 = scmp.ne.s32.totalorder %s988_s1, %s566_s27  ;;  %p570_p1 = scmp.lt.u32.totalorder %s566_s27, %s988_s1 }
   0x9   :  { %p572_p2 = pnand %p570_p1, %p567_p0 }
   0xb   :  { %575 = shalt.err (!%p572_p2)
}
   0xc   :  { %s576_s8 = scalar_lea.vmem %s35_s22, 256  ;;  %p581_p4 = scmp.lt.s32.totalorder %s35_s22, %s35_s22 }
   0xd   :  { %p577_p3 = scmp.ne.s32.totalorder %s35_s22, %s576_s8  ;;  %p582_p5 = scmp.lt.s32.totalorder %s576_s8, %s576_s8 }
   0xf   :  { %p583_p6 = por %p582_p5, %p581_p4 }
  0x11   :  { %p584_p7 = pnand %p583_p6, %p577_p3 }
  0x13   :  { %587 = shalt.err (!%p584_p7)
}
  0x14   :  { %s732_s9 = smov 128   ;;  %s733_s10 = smov 8  }
  0x15   :  { %40 = dma.hbm_to_vmem [thread:$0]  %s988_s1, 256, %s35_s22, [#allocation6], %s732_s9, %s732_s9, %s733_s10  }
  0x16   :  { %s588_s15 = scalar_lea.hbm %s987_s0, 768 }
  0x17   :  { %p589_p8 = scmp.ne.s32.totalorder %s987_s0, %s588_s15  ;;  %p592_p9 = scmp.lt.u32.totalorder %s588_s15, %s987_s0 }
  0x19   :  { %p594_p10 = pnand %p592_p9, %p589_p8 }
  0x1b   :  { %597 = shalt.err (!%p594_p10)
}
  0x1c   :  { %s598_s20 = scalar_lea.vmem %s774_s24, 768  ;;  %p603_p12 = scmp.lt.s32.totalorder %s774_s24, %s774_s24 }
  0x1d   :  { %p599_p11 = scmp.ne.s32.totalorder %s774_s24, %s598_s20  ;;  %p604_p13 = scmp.lt.s32.totalorder %s598_s20, %s598_s20 }
  0x1f   :  { %p605_p0 = por %p604_p13, %p603_p12 }
  0x21   :  { %p606_p1 = pnand %p605_p0, %p599_p11 }
  0x23   :  { %609 = shalt.err (!%p606_p1)
}
  0x24   :  { %28 = dma.hbm_to_vmem [thread:$0]  %s987_s0, 768, %s774_s24, [#allocation3], %s732_s9, %s732_s9, %s733_s10  }
  0x25   :  { %s734_s22 = smov [#allocation7]   ;;  %s610_s27 = scalar_lea.hbm %s989_s2, 256 }
  0x26   :  { %s46_s23 = sshll.u32 %s734_s22, 4  ;;  %p611_p2 = scmp.ne.s32.totalorder %s989_s2, %s610_s27  ;;  %s47_s23 = int_to_ptr.vmem [resolvable:$true] %s46_s23 }
  0x27   :  { %p614_p3 = scmp.lt.u32.totalorder %s610_s27, %s989_s2 }
  0x29   :  { %p616_p4 = pnand %p614_p3, %p611_p2 }
  0x2b   :  { %619 = shalt.err (!%p616_p4)
}
  0x2c   :  { %s620_s8 = scalar_lea.vmem %s47_s23, 256  ;;  %p625_p6 = scmp.lt.s32.totalorder %s47_s23, %s47_s23 }
  0x2d   :  { %p621_p5 = scmp.ne.s32.totalorder %s47_s23, %s620_s8  ;;  %p626_p7 = scmp.lt.s32.totalorder %s620_s8, %s620_s8 }
  0x2f   :  { %p627_p8 = por %p626_p7, %p625_p6 }
  0x31   :  { %p628_p9 = pnand %p627_p8, %p621_p5 }
  0x33   :  { %631 = shalt.err (!%p628_p9)
}
  0x34   :  { %52 = dma.hbm_to_vmem [thread:$0]  %s989_s2, 256, %s47_s23, [#allocation6], %s732_s9, %s732_s9, %s733_s10  }
  0x35   :  { %720 = dma.done.wait [#allocation3], 768  }
  0x36   :  { %721 = vsyncadd [#allocation3], 4294966528 }
  0x37   :  { %722 = dma.done.wait [#allocation6], 512  }
  0x38   :  { %723 = vsyncadd [#allocation6], 4294966784  ;;  %vm76_vm0 = vcmask 1043456   ;;  %v62_v0 = vld [vmem:[#allocation7] sm:$0xff]  ;;  %v826_v1 = vld [vmem:[#allocation7 + $0x8] sm:$0xf] }
  0x39   :  { %v64_v2 = vld [vmem:[#allocation5] sm:$0xff]  ;;  %v65_v3 = vld [vmem:[#allocation5 + $0x8] sm:$0xf]  ;;  %v77_v4 = vsel %vm76_vm0, %v826_v1, inf  ;;  %vm113_vm1 = vcmask 1046528   ;;  %v89_v8 = vsel %vm76_vm0, %v826_v1, -inf }
  0x3a   :  { %v114_v5 = vrot.slane %v64_v2, 1  ;;  %v78_v6 = vmin.f32 %v62_v0, %v77_v4  ;;  %v115_v7 = vrot.slane %v65_v3, 1  ;;  %v90_v9 = vmax.f32 %v62_v0, %v89_v8  ;;  %s735_s2 = smov [#allocation9]   ;;  %s736_s12 = smov [#allocation11]  }
  0x3b   :  { %v221_v21 = vrot.slane %v62_v0, 1  ;;  %v222_v24 = vrot.slane %v826_v1, 1  ;;  %v104_v44 = vrot.slane %v62_v0, 7  ;;  %v105_v45 = vrot.slane %v826_v1, 7  ;;  %s497_s11 = sshll.u32 %s735_s2, 4  ;;  %s506_s13 = sshll.u32 %s736_s12, 4  ;;  %s498_s11 = int_to_ptr.vmem [resolvable:$true] %s497_s11  ;;  %s929_s13 = int_to_ptr.vmem [resolvable:$true] %s506_s13 }
  0x3c   :  { %v79_v10 = vrot.slane %v78_v6, 4  ;;  %v116_v11 = vsel %vm113_vm1, %v114_v5, %v115_v7  ;;  %v120_v12 = vadd.f32 %v115_v7, %v65_v3  ;;  %v91_v14 = vrot.slane %v90_v9, 4  ;;  %s632_s14 = scalar_lea.vmem %s498_s11, 16  ;;  %s636_s15 = scalar_lea.vmem %s498_s11, 32 }
  0x3d   :  { %v119_v13 = vadd.f32 %v116_v11, %v64_v2  ;;  %v223_v31 = vsel %vm113_vm1, %v221_v21, %v222_v24  ;;  %vm103_vm2 = vcmask 1040384   ;;  %v109_v52 = vsub.f32 %v62_v0, %v104_v44  ;;  %p633_p10 = scmp.ne.s32.totalorder %s498_s11, %s632_s14  ;;  %p637_p11 = scmp.lt.s32.totalorder %s498_s11, %s498_s11 }
  0x3e   :  { %v80_v15 = vmin.f32 %v78_v6, %v79_v10  ;;  %v122_v16 = vmul.f32 0.5, %v120_v12  ;;  %v92_v18 = vmax.f32 %v90_v9, %v91_v14  ;;  %v837_v34 = vadd.f32 %v223_v31, %v62_v0  ;;  %p638_p12 = scmp.lt.s32.totalorder %s636_s15, %s632_s14 }
  0x3f   :  { %v121_v17 = vmul.f32 0.5, %v119_v13  ;;  %v106_v48 = vsel %vm103_vm2, %v104_v44, %v105_v45  ;;  %v165_v63 = vrot.slane %v109_v52, 1  ;;  %vm201_vm7 = vcmask 1041408   ;;  %v272_v44 = vld [vmem:[#allocation2] sm:$0x1] }
  0x40   :  { %v81_v19 = vrot.slane %v80_v15, 2  ;;  %v541_v20 = vadd.f32 -1.0, %v122_v16  ;;  %v93_v23 = vrot.slane %v92_v18, 2  ;;  %v110_v53 = vsub.f32 %v826_v1, %v106_v48  ;;  %v274_v45 = vld [vmem:[#allocation2 + $0x20] sm:$0x1]  ;;  %p639_p13 = por %p638_p12, %p637_p11 }
  0x41   :  { %v540_v22 = vadd.f32 -1.0, %v121_v17  ;;  %vm283_vm8 = vcmask 1041409   ;;  %v227_v52 = vadd.f32 %v222_v24, %v826_v1  ;;  %vm286_vm9 = vcmask 1042434   ;;  %v307_v24 = vld [vmem:[#allocation2 + $0x2] sm:$0x1] }
  0x42   :  { %v82_v25 = vmin.f32 %v80_v15, %v81_v19  ;;  %v132_v26 = vand.u32 2147483647, %v541_v20  ;;  %v94_v28 = vmax.f32 %v92_v18, %v93_v23  ;;  %v126_v56 = vmax.f32 %v541_v20, 0.0  ;;  %p640_p0 = pnand %p639_p13, %p633_p10 }
  0x43   :  { %v131_v27 = vand.u32 2147483647, %v540_v22  ;;  %v125_v59 = vmax.f32 %v540_v22, 0.0  ;;  %vm128_vm5 = vcmp.ne.f32.partialorder %v541_v20, %v541_v20  ;;  %v166_v2 = vrot.slane %v110_v53, 1 }
  0x44   :  { %v83_v29 = vrot.slane %v82_v25, 1  ;;  %v134_v30 = vsub.f32 0.0, %v132_v26  ;;  %v95_v33 = vrot.slane %v94_v28, 1  ;;  %vm127_vm6 = vcmp.ne.f32.partialorder %v540_v22, %v540_v22 }
  0x45   :  { %v133_v32 = vsub.f32 0.0, %v131_v27  ;;  %v167_v8 = vsel %vm113_vm1, %v165_v63, %v166_v2  ;;  %v228_v63 = vmul.f32 0.5, %v837_v34  ;;  %vm230_vm10 = vcmask 1042432  }
  0x46   :  { %v84_v35 = vmin.f32 %v82_v25, %v83_v29  ;;  %v137_v36 = vmul.f32 1.442695, %v134_v30  ;;  %v96_v38 = vmax.f32 %v94_v28, %v95_v33  ;;  %v273_v33 = vld [vmem:[#allocation2 + $0x10] sm:$0x1] }
  0x47   :  { %v135_v37 = vmul.f32 1.442695, %v133_v32 }
  0x48   :  { %552 = vpow2.f32 %v137_v36  ;;  %85 = vmin.xlane.f32.xlu0 %v84_v35 }
  0x49   :  { %554 = vpow2.f32 %v135_v37  ;;  %v275_v37 = vlaneseq }
  0x4c   :  { %97 = vmax.xlane.f32.xlu0 %v96_v38  ;;  %v291_v38 = vld [vmem:[#allocation2 + $0x11] sm:$0x1] }
  0x52   :  { %v553_v39 = vpop.eup %552 }
  0x53   :  { %v555_v40 = vpop.eup %554  ;;  %v148_v41 = vadd.f32 1.0, %v553_v39  ;;  %v151_v43 = vmul.f32 -0.5, %v553_v39  ;;  %v154_v50 = vand.u32 2147483647, %v553_v39 }
  0x54   :  { %v139_v42 = vadd.f32 1.0, %v555_v40  ;;  %v142_v46 = vmul.f32 -0.5, %v555_v40  ;;  %v145_v51 = vand.u32 2147483647, %v555_v40 }
  0x55   :  { %556 = vlog2.f32 %v148_v41  ;;  %v152_v47 = vadd.f32 1.0, %v151_v43  ;;  %vm155_vm3 = vcmp.lt.f32.partialorder %v154_v50, 0.0004427343  ;;  %v282_v41 = vrot.slane %v273_v33, 7  ;;  %v290_v50 = vld [vmem:[#allocation2 + $0x1] sm:$0x1] }
  0x56   :  { %558 = vlog2.f32 %v139_v42  ;;  %v143_v49 = vadd.f32 1.0, %v142_v46  ;;  %vm146_vm4 = vcmp.lt.f32.partialorder %v145_v51, 0.0004427343  ;;  %v292_v46 = vld [vmem:[#allocation2 + $0x21] sm:$0x1] }
  0x57   :  { %v153_v54 = vmul.f32 %v553_v39, %v152_v47  ;;  %v300_v47 = vrot.slane %v291_v38, 7  ;;  %v308_v51 = vld [vmem:[#allocation2 + $0x12] sm:$0x1]  ;;  %v284_v53 = vsel %vm283_vm8, %v282_v41, %v272_v44  ;;  %v358_v33 = vld [vmem:[#allocation2 + $0x5] sm:$0x1] }
  0x58   :  { %v144_v57 = vmul.f32 %v555_v40, %v143_v49  ;;  %v852_v49 = vshrl.u32 %v275_v37, 7  ;;  %v377_v44 = vld [vmem:[#allocation2 + $0x26] sm:$0x1] }
  0x5a   :  { %v295_v1 = vsub.s32 1, %v852_v49  ;;  %v363_v37 = vsub.s32 5, %v852_v49 }
  0x5f   :  { %v557_v55 = vpop.eup %556 }
  0x60   :  { %v559_v58 = vpop.eup %558  ;;  %v150_v60 = vmul.f32 0.6931472, %v557_v55 }
  0x61   :  { %v141_v61 = vmul.f32 0.6931472, %v559_v58 }
  0x62   :  { %v156_v62 = vsel %vm155_vm3, %v153_v54, %v150_v60  ;;  %v285_v54 = vrot.slane %v274_v45, 6  ;;  %v309_v60 = vld [vmem:[#allocation2 + $0x22] sm:$0x1]  ;;  %v393_v45 = vld [vmem:[#allocation2 + $0x17] sm:$0x1] }
  0x63   :  { %v147_v3 = vsel %vm146_vm4, %v144_v57, %v141_v61  ;;  %v158_v4 = vadd.f32 %v156_v62, %v126_v56  ;;  %v302_v57 = vrot.slane %v292_v46, 6  ;;  %v317_v61 = vrot.slane %v308_v51, 7  ;;  %v325_v62 = vld [vmem:[#allocation2 + $0x13] sm:$0x1] }
  0x64   :  { %v157_v0 = vadd.f32 %v147_v3, %v125_v59  ;;  %v301_v59 = vsel %vm283_vm8, %v300_v47, %v290_v50  ;;  %v319_v34 = vrot.slane %v309_v60, 6  ;;  %v380_v50 = vsub.s32 6, %v852_v49 }
  0x65   :  { %v160_v5 = vsel %vm128_vm5, %v541_v20, %v158_v4 }
  0x66   :  { %v159_v6 = vsel %vm127_vm6, %v540_v22, %v157_v0  ;;  %v162_v7 = vsub.f32 0.0, %v160_v5  ;;  %v229_v0 = vmul.f32 0.5, %v227_v52  ;;  %v864_v5 = vsel %vm286_vm9, %v285_v54, %v284_v53 }
  0x67   :  { %v161_v9 = vsub.f32 0.0, %v159_v6  ;;  %v326_v6 = vld [vmem:[#allocation2 + $0x23] sm:$0x1] }
  0x68   :  { %v171_v10 = vmul.f32 %v166_v2, %v162_v7  ;;  %v277_v2 = vsub.s32 0, %v852_v49  ;;  %v342_v7 = vld [vmem:[#allocation2 + $0x14] sm:$0x1] }
  0x69   :  { %v170_v11 = vmul.f32 %v167_v8, %v161_v9  ;;  %v867_v8 = vsel %vm286_vm9, %v302_v57, %v301_v59  ;;  %v312_v9 = vsub.s32 2, %v852_v49  ;;  %v387_v57 = vrot.slane %v377_v44, 6 }
  0x6a   :  { %v174_v12 = vmul.f32 1.442695, %v171_v10  ;;  %v334_v10 = vrot.slane %v325_v62, 7  ;;  %v402_v59 = vrot.slane %v393_v45, 7 }
  0x6b   :  { %v172_v13 = vmul.f32 1.442695, %v170_v11  ;;  %v359_v11 = vld [vmem:[#allocation2 + $0x15] sm:$0x1] }
  0x6c   :  { %560 = vpow2.f32 %v174_v12 }
  0x6d   :  { %562 = vpow2.f32 %v172_v13 }
  0x76   :  { %v843_v14 = vpop.eup %560 }
  0x77   :  { %v563_v15 = vpop.eup %562  ;;  %v177_v16 = vsub.f32 1.0, %v843_v14 }
  0x78   :  { %v176_v17 = vsub.f32 1.0, %v563_v15  ;;  %v318_v15 = vsel %vm283_vm8, %v317_v61, %v307_v24 }
  0x79   :  { %v179_v18 = vsub.f32 1.0, %v177_v16 }
  0x7a   :  { %v178_v19 = vsub.f32 1.0, %v176_v17 }
  0x7b   :  { %v181_v20 = vadd.f32 1e-10, %v179_v18  ;;  %v329_v18 = vsub.s32 3, %v852_v49 }
  0x7c   :  { %v180_v21 = vadd.f32 1e-10, %v178_v19  ;;  %v343_v19 = vld [vmem:[#allocation2 + $0x24] sm:$0x1] }
  0x7d   :  { %v185_v22 = vrot.slane %v181_v20, 7 }
  0x7e   :  { %v184_v23 = vrot.slane %v180_v21, 7  ;;  %v336_v21 = vrot.slane %v326_v6, 6 }
  0x80   :  { %v186_v25 = vsel %vm103_vm2, %v184_v23, %v185_v22  ;;  %v189_v26 = vsel %vm103_vm2, 1.0, %v184_v23  ;;  %v346_v22 = vsub.s32 4, %v852_v49  ;;  %v351_v23 = vrot.slane %v342_v7, 7  ;;  %v394_v7 = vld [vmem:[#allocation2 + $0x27] sm:$0x1] }
  0x81   :  { %v191_v27 = vrot.slane %v189_v26, 7  ;;  %v192_v28 = vrot.slane %v186_v25, 7 }
  0x83   :  { %v193_v29 = vsel %vm103_vm2, %v191_v27, %v192_v28  ;;  %v196_v30 = vsel %vm103_vm2, 1.0, %v191_v27  ;;  %v341_v27 = vld [vmem:[#allocation2 + $0x4] sm:$0x1]  ;;  %v368_v28 = vrot.slane %v359_v11, 7 }
  0x84   :  { %v197_v31 = vmul.f32 %v196_v30, %v189_v26  ;;  %v198_v32 = vmul.f32 %v193_v29, %v186_v25  ;;  %v360_v25 = vld [vmem:[#allocation2 + $0x25] sm:$0x1]  ;;  %v320_v30 = vsel %vm286_vm9, %v319_v34, %v318_v15  ;;  %v410_v34 = vld [vmem:[#allocation2 + $0x18] sm:$0x1] }
  0x85   :  { %v370_v38 = vrot.slane %v360_v25, 6 }
  0x86   :  { %v202_v35 = vrot.slane %v197_v31, 6  ;;  %v203_v36 = vrot.slane %v198_v32, 6 }
  0x88   :  { %v204_v39 = vsel %vm201_vm7, %v202_v35, %v203_v36  ;;  %v207_v40 = vsel %vm201_vm7, 1.0, %v202_v35 }
  0x89   :  { %v208_v42 = vmul.f32 %v207_v40, %v197_v31  ;;  %v209_v43 = vmul.f32 %v204_v39, %v198_v32  ;;  %v353_v32 = vrot.slane %v343_v19, 6  ;;  %v376_v39 = vld [vmem:[#allocation2 + $0x16] sm:$0x1] }
  0x8a   :  { %v385_v54 = vrot.slane %v376_v39, 7 }
  0x8b   :  { %v211_v48 = vrot.slane %v208_v42, 4 }
  0x8d   :  { %v213_v55 = vsel %vm76_vm0, 1.0, %v211_v48  ;;  %v215_v56 = vmul.f32 %v211_v48, %v209_v43  ;;  %v352_v43 = vsel %vm283_vm8, %v351_v23, %v341_v27  ;;  %v369_v48 = vsel %vm283_vm8, %v368_v28, %v358_v33  ;;  %v427_v23 = vld [vmem:[#allocation2 + $0x19] sm:$0x1]  ;;  %v411_v33 = vld [vmem:[#allocation2 + $0x28] sm:$0x1] }
  0x8e   :  { %v214_v58 = vmul.f32 %v213_v55, %v208_v42  ;;  %v354_v55 = vsel %vm286_vm9, %v353_v32, %v352_v43  ;;  %v409_v32 = vld [vmem:[#allocation2 + $0x8] sm:$0x1]  ;;  %v421_v44 = vrot.slane %v411_v33, 6 }
  0x90   :  { %v216_v3 = vmul.f32 %v215_v56, %v214_v58  ;;  %v217_v4 = vmul.f32 %v214_v58, %v176_v17  ;;  %v324_v17 = vld [vmem:[#allocation2 + $0x3] sm:$0x1]  ;;  %v375_v56 = vld [vmem:[#allocation2 + $0x6] sm:$0x1]  ;;  %v397_v58 = vsub.s32 7, %v852_v49 }
  0x91   :  { %v335_v31 = vsel %vm283_vm8, %v334_v10, %v324_v17 }
  0x92   :  { %v872_v12 = vmul.f32 %v216_v3, %v177_v16  ;;  %219 = vst [vmem:[#allocation11] sm:$0xff] %v217_v4  ;;  %v254_v13 = vrot.slane %v217_v4, 1  ;;  %v239_v20 = vmul.f32 %v228_v63, %v217_v4  ;;  %v337_v47 = vsel %vm286_vm9, %v336_v21, %v335_v31  ;;  %v392_v21 = vld [vmem:[#allocation2 + $0x7] sm:$0x1] }
  0x93   :  { %v371_v63 = vsel %vm286_vm9, %v370_v38, %v369_v48  ;;  %v445_v48 = vld [vmem:[#allocation2 + $0x2a] sm:$0x1] }
  0x94   :  { %220 = vst [vmem:[#allocation11 + $0x8] sm:$0x7] %v872_v12  ;;  %v231_v14 = vsel %vm230_vm10, %v872_v12, 0.0  ;;  %v240_v16 = vmul.f32 %v229_v0, %v872_v12  ;;  %v255_v26 = vrot.slane %v872_v12, 1 }
  0x95   :  { %v232_v29 = vadd.f32 %v231_v14, %v217_v4  ;;  %v268_v14 = vrot.slane %v872_v12, 7 }
  0x96   :  { %v241_v35 = vsel %vm230_vm10, %v240_v16, 0.0  ;;  %v256_v36 = vsel %vm113_vm1, %v254_v13, %v255_v26  ;;  %v260_v46 = vadd.f32 %v255_v26, %v872_v12  ;;  %v404_v16 = vrot.slane %v394_v7, 6 }
  0x97   :  { %v233_v40 = vrot.slane %v232_v29, 4  ;;  %v242_v41 = vadd.f32 %v241_v35, %v239_v20  ;;  %v259_v42 = vadd.f32 %v256_v36, %v217_v4  ;;  %v419_v26 = vrot.slane %v410_v34, 7 }
  0x98   :  { %v264_v24 = vrot.slane %v260_v46, 7 }
  0x99   :  { %v234_v51 = vadd.f32 %v233_v40, %v232_v29  ;;  %v243_v52 = vrot.slane %v242_v41, 4  ;;  %v263_v53 = vrot.slane %v259_v42, 7  ;;  %v426_v40 = vld [vmem:[#allocation2 + $0x9] sm:$0x1]  ;;  %v461_v42 = vld [vmem:[#allocation2 + $0x1b] sm:$0x1] }
  0x9b   :  { %v235_v60 = vrot.slane %v234_v51, 2  ;;  %v244_v61 = vadd.f32 %v243_v52, %v242_v41  ;;  %v270_v62 = vsel %vm103_vm2, %v217_v4, %v263_v53  ;;  %v386_v4 = vsel %vm283_vm8, %v385_v54, %v375_v56  ;;  %v428_v41 = vld [vmem:[#allocation2 + $0x29] sm:$0x1] }
  0x9c   :  { %v278_v3 = vrot.slane %v270_v62, %v277_v2  ;;  %v296_v0 = vrot.slane %v270_v62, %v295_v1  ;;  %v313_v6 = vrot.slane %v270_v62, %v312_v9  ;;  %v330_v13 = vrot.slane %v270_v62, %v329_v18 }
  0x9d   :  { %v236_v10 = vadd.f32 %v235_v60, %v234_v51  ;;  %v245_v11 = vrot.slane %v244_v61, 2  ;;  %v347_v20 = vrot.slane %v270_v62, %v346_v22  ;;  %v265_v27 = vsel %vm103_vm2, %v263_v53, %v264_v24  ;;  %v462_v24 = vld [vmem:[#allocation2 + $0x2b] sm:$0x1] }
  0x9e   :  { %v289_v15 = vmul.f32 %v864_v5, %v278_v3  ;;  %v305_v17 = vmul.f32 %v867_v8, %v296_v0  ;;  %v322_v19 = vmul.f32 %v320_v30, %v313_v6  ;;  %v339_v29 = vmul.f32 %v337_v47, %v330_v13  ;;  %v444_v30 = vld [vmem:[#allocation2 + $0x1a] sm:$0x1] }
  0x9f   :  { %v237_v25 = vrot.slane %v236_v10, 1  ;;  %v364_v31 = vrot.slane %v270_v62, %v363_v37  ;;  %v388_v5 = vsel %vm286_vm9, %v387_v57, %v386_v4  ;;  %v403_v8 = vsel %vm283_vm8, %v402_v59, %v392_v21 }
  0xa0   :  { %v306_v28 = vadd.f32 %v305_v17, %v289_v15  ;;  %v436_v22 = vrot.slane %v427_v23, 7  ;;  %v246_v36 = vadd.f32 %v245_v11, %v244_v61  ;;  %v356_v39 = vmul.f32 %v354_v55, %v347_v20  ;;  %v460_v61 = vld [vmem:[#allocation2 + $0xb] sm:$0x1] }
  0xa1   :  { %v238_v35 = vadd.f32 %v237_v25, %v236_v10  ;;  %v381_v12 = vrot.slane %v270_v62, %v380_v50  ;;  %v271_v43 = vsel %vm230_vm10, %v265_v27, %v268_v14  ;;  %v420_v37 = vsel %vm283_vm8, %v419_v26, %v409_v32  ;;  %v443_v50 = vld [vmem:[#allocation2 + $0xa] sm:$0x1] }
  0xa2   :  { %v323_v38 = vadd.f32 %v322_v19, %v306_v28  ;;  %v373_v46 = vmul.f32 %v371_v63, %v364_v31  ;;  %v398_v47 = vrot.slane %v270_v62, %v397_v58  ;;  %v453_v51 = vrot.slane %v444_v30, 7 }
  0xa3   :  { %564 = vrcp.f32 %v238_v35  ;;  %v405_v52 = vsel %vm286_vm9, %v404_v16, %v403_v8  ;;  %v437_v53 = vsel %vm283_vm8, %v436_v22, %v426_v40  ;;  %v438_v54 = vrot.slane %v428_v41, 6 }
  0xa4   :  { %v340_v45 = vadd.f32 %v339_v29, %v323_v38  ;;  %v470_v55 = vrot.slane %v461_v42, 7  ;;  %v247_v56 = vrot.slane %v246_v36, 1  ;;  %v390_v59 = vmul.f32 %v388_v5, %v381_v12 }
  0xa5   :  { %v415_v60 = vrot.slane %v271_v43, %v277_v2  ;;  %v422_v63 = vsel %vm286_vm9, %v421_v44, %v420_v37  ;;  %v455_v58 = vrot.slane %v445_v48, 6  ;;  %v407_v3 = vmul.f32 %v405_v52, %v398_v47 }
  0xa6   :  { %v357_v57 = vadd.f32 %v356_v39, %v340_v45  ;;  %v432_v0 = vrot.slane %v271_v43, %v295_v1  ;;  %v454_v6 = vsel %vm283_vm8, %v453_v51, %v443_v50  ;;  %v439_v7 = vsel %vm286_vm9, %v438_v54, %v437_v53 }
  0xa7   :  { %v471_v34 = vsel %vm283_vm8, %v470_v55, %v460_v61  ;;  %v472_v10 = vrot.slane %v462_v24, 6  ;;  %v248_v11 = vadd.f32 %v247_v56, %v246_v36  ;;  %v424_v2 = vmul.f32 %v422_v63, %v415_v60 }
  0xa8   :  { %v374_v62 = vadd.f32 %v373_v46, %v357_v57  ;;  %v449_v4 = vrot.slane %v271_v43, %v312_v9  ;;  %v456_v15 = vsel %vm286_vm9, %v455_v58, %v454_v6  ;;  %v441_v19 = vmul.f32 %v439_v7, %v432_v0 }
  0xa9   :  { %v466_v1 = vrot.slane %v271_v43, %v329_v18  ;;  %v473_v21 = vsel %vm286_vm9, %v472_v10, %v471_v34 }
  0xaa   :  { %v391_v13 = vadd.f32 %v390_v59, %v374_v62  ;;  %v458_v14 = vmul.f32 %v456_v15, %v449_v4 }
  0xab   :  { %v475_v16 = vmul.f32 %v473_v21, %v466_v1 }
  0xac   :  { %v408_v17 = vadd.f32 %v407_v3, %v391_v13 }
  0xad   :  { %v565_v20 = vpop.eup %564 }
  0xae   :  { %v250_v23 = vmul.f32 %v565_v20, %v248_v11  ;;  %v425_v25 = vadd.f32 %v424_v2, %v408_v17 }
  0xb0   :  { %251 = vst [vmem:[#allocation9] sm:$0x1] %v250_v23  ;;  %v442_v9 = vadd.f32 %v441_v19, %v425_v25 }
  0xb1   :  { %643 = shalt.err (!%p640_p0)
}
  0xb2   :  { %s644_s18 = scalar_lea.hbm %s991_s4, 16 }
  0xb3   :  { %p645_p1 = scmp.ne.s32.totalorder %s991_s4, %s644_s18  ;;  %p648_p2 = scmp.lt.u32.totalorder %s644_s18, %s991_s4 }
  0xb5   :  { %p650_p3 = pnand %p648_p2, %p645_p1 }
  0xb7   :  { %653 = shalt.err (!%p650_p3)
}
  0xb8   :  { %500 = dma.vmem_to_hbm [thread:$0]  %s498_s11, 16, %s991_s4, [#allocation10]   ;;  %v459_v49 = vadd.f32 %v458_v14, %v442_v9 }
  0xb9   :  { %s654_s25 = scalar_lea.vmem %s929_s13, 256  ;;  %p659_p5 = scmp.lt.s32.totalorder %s929_s13, %s929_s13 }
  0xba   :  { %p655_p4 = scmp.ne.s32.totalorder %s929_s13, %s654_s25  ;;  %p660_p6 = scmp.lt.s32.totalorder %s654_s25, %s654_s25 }
  0xbc   :  { %p661_p7 = por %p660_p6, %p659_p5 }
  0xbe   :  { %p662_p8 = pnand %p661_p7, %p655_p4 }
  0xc0   :  { %665 = shalt.err (!%p662_p8)
}
  0xc1   :  { %s666_s28 = scalar_lea.hbm %s992_s5, 256 }
  0xc2   :  { %p667_p9 = scmp.ne.s32.totalorder %s992_s5, %s666_s28  ;;  %p670_p10 = scmp.lt.u32.totalorder %s666_s28, %s992_s5 }
  0xc4   :  { %p672_p11 = pnand %p670_p10, %p667_p9 }
  0xc6   :  { %675 = shalt.err (!%p672_p11)
}
  0xc7   :  { %512 = dma.vmem_to_hbm [thread:$0]  %s929_s13, 256, %s992_s5, [#allocation10], %s732_s9, %s732_s9, %s733_s10   ;;  %v476_v18 = vadd.f32 %v475_v16, %v459_v49 }
  0xc8   :  { %s737_s24 = smov [#allocation8]  }
  0xc9   :  { %v477_v26 = vmul.f32 0.5, %v476_v18  ;;  %s487_s2 = sshll.u32 %s737_s24, 4  ;;  %s488_s2 = int_to_ptr.vmem [resolvable:$true] %s487_s2 }
  0xca   :  { %s676_s11 = scalar_lea.vmem %s488_s2, 64  ;;  %p681_p13 = scmp.lt.s32.totalorder %s488_s2, %s488_s2 }
  0xcb   :  { %v478_v27 = vmul.f32 2.0, %v477_v26  ;;  %p677_p12 = scmp.ne.s32.totalorder %s488_s2, %s676_s11  ;;  %p682_p0 = scmp.lt.s32.totalorder %s676_s11, %s676_s11 }
  0xcd   :  { %v542_v28 = vadd.f32 -1.0, %v478_v27  ;;  %p683_p1 = por %p682_p0, %p681_p13 }
  0xcf   :  { %480 = vst [vmem:[#allocation8] sm:$0x7] %v542_v28  ;;  %p684_p2 = pnand %p683_p1, %p677_p12 }
  0xd1   :  { %687 = shalt.err (!%p684_p2)
}
  0xd2   :  { %s688_s15 = scalar_lea.hbm %s990_s3, 64 }
  0xd3   :  { %p689_p3 = scmp.ne.s32.totalorder %s990_s3, %s688_s15  ;;  %p692_p4 = scmp.lt.u32.totalorder %s688_s15, %s990_s3 }
  0xd5   :  { %p694_p5 = pnand %p692_p4, %p689_p3 }
  0xd7   :  { %697 = shalt.err (!%p694_p5)
}
  0xd8   :  { %490 = dma.vmem_to_hbm [thread:$0]  %s488_s2, 64, %s990_s3, [#allocation4]   ;;  %v86_v29 = vpop.xlane.xlu0 %85 }
  0xd9   :  { %s738_s18 = smov [#allocation12]   ;;  %99 = vst [vmem:[#allocation12] sm:$0xf] %v86_v29 }
  0xda   :  { %s519_s19 = sshll.u32 %s738_s18, 4  ;;  %s520_s19 = int_to_ptr.vmem [resolvable:$true] %s519_s19 }
  0xdb   :  { %s698_s20 = scalar_lea.vmem %s520_s19, 128  ;;  %p703_p7 = scmp.lt.s32.totalorder %s520_s19, %s520_s19 }
  0xdc   :  { %v98_v31 = vpop.xlane.xlu0 %97  ;;  %p699_p6 = scmp.ne.s32.totalorder %s520_s19, %s698_s20  ;;  %p704_p8 = scmp.lt.s32.totalorder %s698_s20, %s698_s20 }
  0xdd   :  { %100 = vst [vmem:[#allocation12 + $0x4] sm:$0xf] %v98_v31 }
  0xde   :  { %p705_p9 = por %p704_p8, %p703_p7 }
  0xe0   :  { %p706_p10 = pnand %p705_p9, %p699_p6 }
  0xe2   :  { %709 = shalt.err (!%p706_p10)
}
  0xe3   :  { %s710_s22 = scalar_lea.hbm %s993_s6, 128 }
  0xe4   :  { %p711_p11 = scmp.ne.s32.totalorder %s993_s6, %s710_s22  ;;  %p714_p12 = scmp.lt.u32.totalorder %s710_s22, %s993_s6 }
  0xe6   :  { %p716_p13 = pnand %p714_p12, %p711_p11 }
  0xe8   :  { %719 = shalt.err (!%p716_p13)
}
  0xe9   :  { %522 = dma.vmem_to_hbm [thread:$0]  %s520_s19, 128, %s993_s6, [#allocation13]  }
  0xea   :  { %724 = dma.done.wait [#allocation4], 64  }
  0xeb   :  { %725 = vsyncadd [#allocation4], 4294967232 }
  0xec   :  { %726 = dma.done.wait [#allocation10], 272  }
  0xed   :  { %727 = vsyncadd [#allocation10], 4294967024 }
  0xee   :  { %728 = dma.done.wait [#allocation13], 128  }
  0xef   :  { %729 = vsyncadd [#allocation13], 4294967168 }
  0xf0   :  { %535 = vsyncpa [#allocation3], 1 }
  0xf1   :  { %536 = vsyncpa [#allocation6], 1 }
  0xf2   :  { %537 = vsyncpa [#allocation4], 1 }
  0xf3   :  { %538 = vsyncpa [#allocation10], 1 }
  0xf4   :  { %539 = vsyncpa [#allocation13], 1 }

</bundles_post_ra>
